<compile_context>
chip_gen: v6e
topology: v6e:2x2x1
jax: 0.10.0
libtpu: 0.0.40
codegen_flags: <defaults>
</compile_context>

<pallas_src>
import functools

import jax
import jax.numpy as jnp
import numpy as np
from jax import lax
from jax.experimental import pallas as pl
from jax.experimental.pallas import tpu as pltpu


_F_CHUNK = 512  # faces per one-hot gather chunk (multiple of 128)


def _flat_shader_kernel(bg_ref, fvc_ref, bary_ref, p2f_ref, out_ref):
    # bg_ref  : VMEM (4, 1)      f32  [r, g, b, 1] background RGBA
    # fvc_ref : VMEM (9, F_pad)  f32  face-vertex colors, row = 3*vertex + channel
    # bary_ref: VMEM (3, T)      f32  k=0 barycentrics, planar
    # p2f_ref : VMEM (1, T)      i32  k=0 pix_to_face (-1 = background)
    # out_ref : VMEM (4, T)      f32  planar RGBA for this pixel tile
    F = fvc_ref.shape[1]
    T = out_ref.shape[1]

    p2f = p2f_ref[...]                                        # (1, T)
    is_bg = p2f < 0                                           # (1, T)
    bary = bary_ref[...]                                      # (3, T)

    def gather(base, width):
        # One-hot gather of face colors via an MXU matmul.  Every one-hot
        # column has at most one nonzero; HIGHEST precision guarantees the
        # full-f32 face colors survive (no single bf16 pass on any chip).
        # NOTE: ids >= F (invalid fragments) silently gather 0, whereas the
        # pure-JAX reference clips; valid PyTorch3D fragments never do that.
        ids = base + lax.broadcasted_iota(jnp.int32, (width, T), 0)
        onehot = (ids == p2f).astype(jnp.float32)             # (width, T)
        return jnp.dot(fvc_ref[:, pl.ds(base, width)], onehot,
                       precision=lax.Precision.HIGHEST,
                       preferred_element_type=jnp.float32)    # (9, T)

    if F <= _F_CHUNK:
        g = gather(0, F)
    else:
        # Chunk over faces so the one-hot intermediate never scales with F.
        def body(c, acc):
            base = pl.multiple_of(c * _F_CHUNK, _F_CHUNK)
            return acc + gather(base, _F_CHUNK)

        g = lax.fori_loop(0, F // _F_CHUNK, body,
                          jnp.zeros((9, T), jnp.float32))

    # Vectorized barycentric blend over all three channels at once: (3, T).
    texel = (bary[0:1] * g[0:3]
             + bary[1:2] * g[3:6]
             + bary[2:3] * g[6:9])                            # (3, T)

    bg_rgb = jnp.broadcast_to(bg_ref[0:3, :], (3, T))
    mask = jnp.broadcast_to(is_bg, (3, T))
    out_ref[0:3, :] = jnp.where(mask, bg_rgb, texel)          # hard_rgb_blend
    out_ref[3:4, :] = jnp.ones((1, T), out_ref.dtype)         # alpha = 1


def _vmem_budget_bytes():
    """Per-generation scoped-VMEM budget (v5e/v6e: 128 MiB physical, v7x: 64 MiB)."""
    cap = 64 * 1024 * 1024
    try:
        info = pltpu.get_tpu_info()
        cap = int(getattr(info, "vmem_capacity_bytes", cap)) or cap
    except Exception:
        pass
    budget = min(cap // 2, 48 * 1024 * 1024)
    limit = min(budget + 16 * 1024 * 1024, (cap * 3) // 4)
    return budget, limit


def _pick_tile(P, f_chunk, f_pad, budget):
    """Lane-dense pixel tile under the VMEM budget (decoupled from total F via
    the chunked gather), capped so the grid has several steps (v7x 2 TCs)."""
    per_px = (
        2 * 4 * (3 + 1 + 4)       # double-buffered bary / p2f / out blocks
        + 4 * f_chunk             # f32 one-hot chunk
        + 4 * 9                   # gather accumulator g
        + 4 * 16                  # texel / loaded copies / slack
    )
    fixed = 2 * 9 * f_pad * 4     # resident (double-buffered) face-color table
    avail = max(budget - fixed, 128 * per_px)
    tile_budget = max(128, (avail // per_px) // 128 * 128)

    p_ceil = ((P + 127) // 128) * 128
    tile_split = max(128, (p_ceil // 4) // 128 * 128)         # >= ~4 grid steps
    tile = int(max(128, min(tile_budget, tile_split, 32 * 1024, p_ceil)))

    # Re-balance so padding waste stays below one (8,128) row per step.
    n_steps = max(1, -(-p_ceil // tile))
    tile = int(max(128, ((-(-p_ceil // n_steps) + 127) // 128) * 128))
    return tile


@functools.partial(jax.jit, static_argnames=("background_color",))
def flat_shader(pix_to_face, bary_coords, face_vertex_colors,
                background_color=(1.0, 1.0, 1.0)):
    """FlatShader.forward.

    pix_to_face        : (N, H, W, K) int32, -1 = background
    bary_coords        : (N, H, W, K, 3) float32
    face_vertex_colors : (F, 3, 3) float32 (per-face, per-vertex RGB texture)
    returns            : (N, H, W, 4) float32 RGBA
    """
    N, H, W, K = pix_to_face.shape
    F = face_vertex_colors.shape[0]
    P = N * H * W

    # hard_rgb_blend only ever reads k = 0 -> drop K before any kernel HBM
    # traffic.  Under jit the slice + transpose + pad fuse into one pre-pass.
    p2f0 = pix_to_face[..., 0].astype(jnp.int32).reshape(1, P)            # (1, P)
    bary0 = bary_coords[..., 0, :].astype(jnp.float32).reshape(P, 3).T    # (3, P)

    # Face-vertex color table (row = 3*vertex + channel), padded to the gather
    # chunk so the in-kernel fori_loop sees equal-width chunks.
    fvc_tbl = face_vertex_colors.astype(jnp.float32).reshape(F, 9).T      # (9, F)
    if F > _F_CHUNK:
        F_pad = ((F + _F_CHUNK - 1) // _F_CHUNK) * _F_CHUNK
        fvc_tbl = jnp.pad(fvc_tbl, ((0, 0), (0, F_pad - F)))
    else:
        F_pad = F

    budget, vmem_limit = _vmem_budget_bytes()
    tile = _pick_tile(P, min(F_pad, _F_CHUNK), F_pad, budget)
    P_pad = ((P + tile - 1) // tile) * tile
    if P_pad != P:
        p2f0 = jnp.pad(p2f0, ((0, 0), (0, P_pad - P)), constant_values=-1)
        bary0 = jnp.pad(bary0, ((0, 0), (0, P_pad - P)))

    # Background RGBA (alpha pinned to 1), small resident VMEM block.
    bg = jnp.concatenate(
        [jnp.asarray(background_color, jnp.float32).reshape(3),
         jnp.ones((1,), jnp.float32)]).reshape(4, 1)

    out = pl.pallas_call(
        _flat_shader_kernel,
        out_shape=jax.ShapeDtypeStruct((4, P_pad), jnp.float32),
        grid=(P_pad // tile,),
        in_specs=[
            pl.BlockSpec((4, 1), lambda i: (0, 0)),           # background RGBA
            pl.BlockSpec((9, F_pad), lambda i: (0, 0)),       # resident color table
            pl.BlockSpec((3, tile), lambda i: (0, i)),        # k=0 barycentrics
            pl.BlockSpec((1, tile), lambda i: (0, i)),        # k=0 pix_to_face
        ],
        out_specs=pl.BlockSpec((4, tile), lambda i: (0, i)),
        compiler_params=pltpu.CompilerParams(
            dimension_semantics=("parallel",),                # megacore / v7x 2 TCs
            vmem_limit_bytes=int(vmem_limit)),
    )(bg, fvc_tbl, bary0, p2f0)

    # Back to PyTorch3D channels-last (N, H, W, 4) — one fused transpose pass.
    return out[:, :P].T.reshape(N, H, W, 4)


def flat_shader_reference(pix_to_face, bary_coords, face_vertex_colors, background_color):
    """Pure-JAX reference matching PyTorch3D sample_textures + hard_rgb_blend."""
    safe_idx = jnp.clip(pix_to_face, 0, face_vertex_colors.shape[0] - 1)
    fvc = face_vertex_colors[safe_idx]                                    # (N,H,W,K,3,3)
    texels = jnp.einsum('nhwkj,nhwkjc->nhwkc', bary_coords, fvc)          # (N,H,W,K,3)
    is_bg = pix_to_face[..., 0] < 0                                       # (N,H,W)
    bg = jnp.asarray(background_color, jnp.float32)
    rgb = jnp.where(is_bg[..., None], bg, texels[..., 0, :])              # (N,H,W,3)
    alpha = jnp.ones(rgb.shape[:-1] + (1,), rgb.dtype)
    return jnp.concatenate([rgb, alpha], axis=-1)                         # (N,H,W,4)


if __name__ == "__main__":
    # Small, deterministic synthetic fragments / mesh textures.
    N, H, W, K, F = 2, 16, 16, 2, 20
    key = jax.random.PRNGKey(0)
    k1, k2, k3 = jax.random.split(key, 3)

    # pix_to_face in [-1, F); -1 marks background pixels.
    pix_to_face = jax.random.randint(k1, (N, H, W, K), -1, F, dtype=jnp.int32)

    # Barycentric coords: positive and normalized to sum to 1 along last axis.
    bary_raw = jax.random.uniform(k2, (N, H, W, K, 3), dtype=jnp.float32,
                                  minval=0.05, maxval=1.0)
    bary_coords = bary_raw / jnp.sum(bary_raw, axis=-1, keepdims=True)

    # Per-face per-vertex RGB colors (the mesh "texture"), deterministic.
    face_vertex_colors = jax.random.uniform(k3, (F, 3, 3), dtype=jnp.float32)

    # BlendParams default background color.
    background_color = (1.0, 1.0, 1.0)

    images = flat_shader(pix_to_face, bary_coords, face_vertex_colors,
                         background_color=background_color)
    images = jax.block_until_ready(images)

    ref = flat_shader_reference(pix_to_face, bary_coords, face_vertex_colors,
                                background_color)
    ref = jax.block_until_ready(ref)

    assert images.shape == (N, H, W, 4), images.shape
    np.testing.assert_allclose(np.asarray(images), np.asarray(ref), rtol=1e-5, atol=1e-5)

    print("KERNEL_OK")
</pallas_src>

<mosaic_0001>
module attributes {stable_mosaic.version = 11 : i64} {
  func.func @_flat_shader_kernel(%arg0: i32, %arg1: memref<4x1xf32, #tpu.memory_space<vmem>>, %arg2: memref<9x20xf32, #tpu.memory_space<vmem>>, %arg3: memref<3x128xf32, #tpu.memory_space<vmem>>, %arg4: memref<1x128xi32, #tpu.memory_space<vmem>>, %arg5: memref<4x128xf32, #tpu.memory_space<vmem>>) attributes {dimension_semantics = [#tpu.dimension_semantics<parallel>], iteration_bounds = array<i64: 4>, scalar_prefetch = 0 : i64, scratch_operands = 0 : i64, tpu.core_type = #tpu.core_type<tc>, window_params = [{pipeline_mode = #tpu.pipeline_mode<synchronous>, transform_indices = @transform_0, window_bounds = array<i64: 4, 1>}, {pipeline_mode = #tpu.pipeline_mode<synchronous>, transform_indices = @transform_1, window_bounds = array<i64: 9, 20>}, {transform_indices = @transform_2, window_bounds = array<i64: 3, 128>}, {transform_indices = @transform_3, window_bounds = array<i64: 1, 128>}, {transform_indices = @transform_4, window_bounds = array<i64: 4, 128>}]} {
    %c0 = arith.constant 0 : index
    %c0_0 = arith.constant 0 : index
    %0 = vector.load %arg4[%c0, %c0_0] : memref<1x128xi32, #tpu.memory_space<vmem>>, vector<1x128xi32>
    %c0_i32 = arith.constant 0 : i32
    %1 = vector.broadcast %c0_i32 : i32 to vector<1x128xi32>
    %2 = arith.cmpi slt, %0, %1 : vector<1x128xi32>
    %c0_1 = arith.constant 0 : index
    %c0_2 = arith.constant 0 : index
    %3 = vector.load %arg3[%c0_1, %c0_2] : memref<3x128xf32, #tpu.memory_space<vmem>>, vector<3x128xf32>
    %4 = tpu.iota {dimensions = array<i32: 0>} : vector<20x128xi32>
    %c0_i32_3 = arith.constant 0 : i32
    %5 = vector.broadcast %c0_i32_3 : i32 to vector<20x128xi32>
    %6 = arith.addi %5, %4 : vector<20x128xi32>
    %7 = vector.broadcast %0 : vector<1x128xi32> to vector<20x128xi32>
    %8 = arith.cmpi eq, %6, %7 : vector<20x128xi32>
    %9 = arith.extui %8 : vector<20x128xi1> to vector<20x128xi32>
    %10 = arith.sitofp %9 : vector<20x128xi32> to vector<20x128xf32>
    %c0_4 = arith.constant 0 : index
    %c0_5 = arith.constant 0 : index
    %11 = vector.load %arg2[%c0_4, %c0_5] : memref<9x20xf32, #tpu.memory_space<vmem>>, vector<9x20xf32>
    %cst = arith.constant dense<0.000000e+00> : vector<9x128xf32>
    %12 = tpu.matmul %11, %10, %cst {dimension_numbers = #tpu.dot_dimension_numbers<[1], [0], [0], [1], [0, 0, 1, 1], [], []>, precision = #tpu.contract_precision<fp32>} : vector<9x20xf32>, vector<20x128xf32>, vector<9x128xf32> -> vector<9x128xf32>
    %13 = vector.extract_strided_slice %3 {offsets = [0, 0], sizes = [1, 128], strides = [1, 1]} : vector<3x128xf32> to vector<1x128xf32>
    %14 = vector.extract_strided_slice %12 {offsets = [0, 0], sizes = [3, 128], strides = [1, 1]} : vector<9x128xf32> to vector<3x128xf32>
    %15 = vector.broadcast %13 : vector<1x128xf32> to vector<3x128xf32>
    %16 = arith.mulf %15, %14 : vector<3x128xf32>
    %17 = vector.extract_strided_slice %3 {offsets = [1, 0], sizes = [1, 128], strides = [1, 1]} : vector<3x128xf32> to vector<1x128xf32>
    %18 = vector.extract_strided_slice %12 {offsets = [3, 0], sizes = [3, 128], strides = [1, 1]} : vector<9x128xf32> to vector<3x128xf32>
    %19 = vector.broadcast %17 : vector<1x128xf32> to vector<3x128xf32>
    %20 = arith.mulf %19, %18 : vector<3x128xf32>
    %21 = arith.addf %16, %20 : vector<3x128xf32>
    %22 = vector.extract_strided_slice %3 {offsets = [2, 0], sizes = [1, 128], strides = [1, 1]} : vector<3x128xf32> to vector<1x128xf32>
    %23 = vector.extract_strided_slice %12 {offsets = [6, 0], sizes = [3, 128], strides = [1, 1]} : vector<9x128xf32> to vector<3x128xf32>
    %24 = vector.broadcast %22 : vector<1x128xf32> to vector<3x128xf32>
    %25 = arith.mulf %24, %23 : vector<3x128xf32>
    %26 = arith.addf %21, %25 : vector<3x128xf32>
    %c0_6 = arith.constant 0 : index
    %c0_7 = arith.constant 0 : index
    %27 = vector.load %arg1[%c0_6, %c0_7] : memref<4x1xf32, #tpu.memory_space<vmem>>, vector<3x1xf32>
    %28 = vector.shape_cast %27 : vector<3x1xf32> to vector<3x1xf32>
    %29 = vector.broadcast %28 : vector<3x1xf32> to vector<3x128xf32>
    %30 = vector.shape_cast %2 : vector<1x128xi1> to vector<1x128xi1>
    %31 = vector.broadcast %30 : vector<1x128xi1> to vector<3x128xi1>
    %32 = arith.select %31, %29, %26 : vector<3x128xi1>, vector<3x128xf32>
    %c0_8 = arith.constant 0 : index
    %c0_9 = arith.constant 0 : index
    %33 = vector.load %arg5[%c0_8, %c0_9] : memref<4x128xf32, #tpu.memory_space<vmem>>, vector<3x128xf32>
    tpu.vector_store %arg5[%c0_8, %c0_9], %32 {strides = array<i32>} : memref<4x128xf32, #tpu.memory_space<vmem>>, vector<3x128xf32>,
    %cst_10 = arith.constant 1.000000e+00 : f32
    %34 = vector.broadcast %cst_10 : f32 to vector<1x128xf32>
    %c3 = arith.constant 3 : index
    %c0_11 = arith.constant 0 : index
    %35 = vector.load %arg5[%c3, %c0_11] : memref<4x128xf32, #tpu.memory_space<vmem>>, vector<1x128xf32>
    tpu.vector_store %arg5[%c3, %c0_11], %34 {strides = array<i32>} : memref<4x128xf32, #tpu.memory_space<vmem>>, vector<1x128xf32>,
    return
  }
  func.func @transform_0(%arg0: i32) -> (i32, i32) {
    %c0_i32 = arith.constant 0 : i32
    %c0_i32_0 = arith.constant 0 : i32
    %c0_i32_1 = arith.constant 0 : i32
    return %c0_i32, %c0_i32_0 : i32, i32
  }
  func.func @transform_1(%arg0: i32) -> (i32, i32) {
    %c0_i32 = arith.constant 0 : i32
    %c0_i32_0 = arith.constant 0 : i32
    %c0_i32_1 = arith.constant 0 : i32
    return %c0_i32, %c0_i32_0 : i32, i32
  }
  func.func @transform_2(%arg0: i32) -> (i32, i32) {
    %c0_i32 = arith.constant 0 : i32
    %c0_i32_0 = arith.constant 0 : i32
    return %c0_i32, %arg0 : i32, i32
  }
  func.func @transform_3(%arg0: i32) -> (i32, i32) {
    %c0_i32 = arith.constant 0 : i32
    %c0_i32_0 = arith.constant 0 : i32
    return %c0_i32, %arg0 : i32, i32
  }
  func.func @transform_4(%arg0: i32) -> (i32, i32) {
    %c0_i32 = arith.constant 0 : i32
    %c0_i32_0 = arith.constant 0 : i32
    return %c0_i32, %arg0 : i32, i32
  }
}

</mosaic_0001>

<bundles_post_ra>
// kernel: squeeze.2
= control target key start
LH: loop header
LB: loop body
LE: loop exit
PB: predicated region body
PF: predicated region fallthrough
CT: control target
= control target key end

     0   :  { %s94_s8 = smov 112   ;;  %s95_s11 = smov 80   ;;  %vm3_vm0 = vcmask 130048   ;;  %vm9_vm1 = vcmask 1048448   ;;  %vm15_vm2 = vcmask 917248   ;;  %vm21_vm3 = vcmask 786048   ;;  %s147_s0 = inlined_call_operand.vmem [shape: s32[2,16,16], index: 0, kind: input, shape index: {}]   ;;  %s148_s1 = inlined_call_operand.vmem [shape: s32[1,512], index: 1, kind: output, shape index: {}]  }
   0x1   :  { %v77_v0 = vld [vmem:[%s147_s0 + $0x7] ss:$8 sm:$0xf]   ;;  %v79_v1 = vld [vmem:[%s147_s0 + $0x5] ss:$8 sm:$0xf]  }
   0x2   :  { %7 = vrot.lane.b32.xlu0 %v77_v0, %s94_s8  ;;  %19 = vrot.lane.b32.xlu1 %v79_v1, %s95_s11  ;;  %v78_v2 = vld [vmem:[%s147_s0 + $0x6] ss:$8 sm:$0xf]   ;;  %v80_v3 = vld [vmem:[%s147_s0 + $0x4] ss:$8 sm:$0xf]  }
   0x3   :  { %s96_s16 = smov 96   ;;  %v2_v4 = vld [vmem:[%s147_s0] ss:$8 sm:$0xf]   ;;  %s97_s19 = smov 64   ;;  %vm27_vm4 = vcmask 654848  }
   0x4   :  { %v81_v5 = vld [vmem:[%s147_s0 + $0x3] ss:$8 sm:$0xf]   ;;  %4 = vst.msk [vmem:[#allocation0] ss:$8 sm:$0xf] %vm3_vm0, %v2_v4  }
   0x5   :  { %v82_v6 = vld [vmem:[%s147_s0 + $0x2] ss:$8 sm:$0xf]   ;;  %s98_s24 = smov 48   ;;  %s99_s25 = smov 32   ;;  %vm33_vm5 = vcmask 523648  }
   0x6   :  { %13 = vrot.lane.b32.xlu0 %v78_v2, %s96_s16  ;;  %25 = vrot.lane.b32.xlu1 %v80_v3, %s97_s19  ;;  %v83_v7 = vld [vmem:[%s147_s0 + $0x1] ss:$8 sm:$0xf]   ;;  %s100_s0 = smov 16   ;;  %vm39_vm6 = vcmask 392448   ;;  %vm45_vm7 = vcmask 261248  }
   0xa   :  { %31 = vrot.lane.b32.xlu0 %v81_v5, %s98_s24  ;;  %37 = vrot.lane.b32.xlu1 %v82_v6, %s99_s25 }
   0xe   :  { %43 = vrot.lane.b32.xlu0 %v83_v7, %s100_s0 }
  0x74   :  { %v8_v8 = vpop.permute.xlu0 %7   ;;  %v20_v9 = vpop.permute.xlu1 %19  }
  0x75   :  { %10 = vst.msk [vmem:[#allocation0] ss:$8 sm:$0xf] %vm9_vm1, %v8_v8  }
  0x78   :  { %v14_v10 = vpop.permute.xlu0 %13   ;;  %v26_v11 = vpop.permute.xlu1 %25  }
  0x79   :  { %16 = vst.msk [vmem:[#allocation0] ss:$8 sm:$0xf] %vm15_vm2, %v14_v10  }
  0x7a   :  { %22 = vst.msk [vmem:[#allocation0] ss:$8 sm:$0xf] %vm21_vm3, %v20_v9  }
  0x7b   :  { %28 = vst.msk [vmem:[#allocation0] ss:$8 sm:$0xf] %vm27_vm4, %v26_v11  }
  0x7c   :  { %v32_v12 = vpop.permute.xlu0 %31   ;;  %v38_v13 = vpop.permute.xlu1 %37  }
  0x7d   :  { %34 = vst.msk [vmem:[#allocation0] ss:$8 sm:$0xf] %vm33_vm5, %v32_v12  }
  0x7e   :  { %40 = vst.msk [vmem:[#allocation0] ss:$8 sm:$0xf] %vm39_vm6, %v38_v13  }
  0x80   :  { %v44_v14 = vpop.permute.xlu0 %43  }
  0x81   :  { %46 = vst.msk [vmem:[#allocation0] ss:$8 sm:$0xf] %vm45_vm7, %v44_v14  }
  0x88   :  { %v51_v15 = vld [vmem:[#allocation0] sm:$0x1]  ;;  %v56_v16 = vld [vmem:[#allocation0 + $0x8] sm:$0x1]  ;;  %v62_v17 = vld [vmem:[#allocation0 + $0x10] sm:$0x1] }
  0x89   :  { %54 = vst [vmem:[%s148_s1] sm:$0x1] %v51_v15  ;;  %84 = vst [vmem:[%s148_s1 + $0x1] sm:$0x1] %v56_v16  ;;  %v69_v18 = vld [vmem:[#allocation0 + $0x18] sm:$0x1] }
  0x8a   :  { %85 = vst [vmem:[%s148_s1 + $0x2] sm:$0x1] %v62_v17  ;;  %86 = vst [vmem:[%s148_s1 + $0x3] sm:$0x1] %v69_v18 }

// kernel: squeeze.3
= control target key start
LH: loop header
LB: loop body
LE: loop exit
PB: predicated region body
PF: predicated region fallthrough
CT: control target
= control target key end

     0   :  { %vm52_vm0 = vcmask 1042434   ;;  %vm56_vm1 = vcmask 1043459   ;;  %s98_s6 = smov 3  ;;  %s48_s13 = smov 3  ;;  %vm19_vm2 = vcmask 1041409   ;;  %vm24_vm3 = vcmask 1043458   ;;  %s749_s0 = inlined_call_operand.vmem [shape: f32[2,16,16,1,3], index: 0, kind: input, shape index: {}]   ;;  %s750_s1 = inlined_call_operand.vmem [shape: f32[512,3], index: 1, kind: output, shape index: {}]  }
   0x1   :  { %v412_v0 = vld [vmem:[%s749_s0 + $0x3c] sm:$0x4]   ;;  %v402_v4 = vld [vmem:[%s749_s0 + $0x57] ss:$-56 sm:%s48_s13]   ;;  %v405_v9 = vld [vmem:[%s749_s0 + $0x6] sm:$0x1]  }
   0x2   :  { %v411_v1 = vld [vmem:[%s749_s0 + $0x56] ss:$-56 sm:%s98_s6]   ;;  %v403_v5 = vld [vmem:[%s749_s0 + $0x3d] sm:$0x4]   ;;  %s469_s24 = smov 96   ;;  %vm28_vm4 = vcmask 1044484  }
   0x3   :  { %v413_v2 = vld [vmem:[%s749_s0 + $0x5b] sm:$0x8]   ;;  %v103_v3 = vsel %vm52_vm0, %v412_v0, %v411_v1  ;;  %v404_v6 = vld [vmem:[%s749_s0 + $0x5c] sm:$0x8]   ;;  %v53_v8 = vsel %vm52_vm0, %v403_v5, %v402_v4  ;;  %v406_v10 = vld [vmem:[%s749_s0 + $0x25] sm:$0x2]  }
   0x4   :  { %v107_v7 = vsel %vm56_vm1, %v413_v2, %v103_v3  ;;  %v57_v11 = vsel %vm56_vm1, %v404_v6, %v53_v8  ;;  %vm33_vm5 = vcmask 1046533   ;;  %vm37_vm6 = vcmask 1047559   ;;  %s72_s25 = smov 12  ;;  %v408_v12 = vld [vmem:[%s749_s0 + $0x2a] sm:$0x10]   ;;  %s470_s28 = smov 112  }
   0x5   :  { %108 = vrot.lane.b32.xlu1 %v107_v7, %s469_s24  ;;  %58 = vrot.lane.b32.xlu0 %v57_v11, %s470_s28  ;;  %v70_v13 = vsel %vm19_vm2, %v406_v10, %v405_v9  ;;  %v407_v14 = vld [vmem:[%s749_s0 + $0xb6] ss:$-56 sm:%s72_s25]   ;;  %s81_s2 = smov 96  ;;  %s22_s5 = smov 12  ;;  %vm4_vm7 = vcmask 1047556   ;;  %vm6_vm8 = vcmask 130048  }
   0x6   :  { %v410_v15 = vld [vmem:[%s749_s0 + $0x2f] sm:$0x80]   ;;  %v75_v16 = vsel %vm24_vm3, %v407_v14, %v70_v13  ;;  %v396_v18 = vld [vmem:[%s749_s0 + $0x7] sm:$0x1]   ;;  %v399_v23 = vld [vmem:[%s749_s0 + $0x2b] sm:$0x10]  }
   0x7   :  { %v409_v17 = vld [vmem:[%s749_s0 + $0x166] ss:$-56 sm:%s81_s2]   ;;  %v397_v19 = vld [vmem:[%s749_s0 + $0x26] sm:$0x2]   ;;  %v79_v20 = vsel %vm28_vm4, %v408_v12, %v75_v16  ;;  %s31_s16 = smov 96  ;;  %s148_s21 = smov 3 }
   0x8   :  { %v20_v21 = vsel %vm19_vm2, %v397_v19, %v396_v18  ;;  %v398_v22 = vld [vmem:[%s749_s0 + $0xb7] ss:$-56 sm:%s22_s5]   ;;  %v84_v24 = vsel %vm33_vm5, %v409_v17, %v79_v20  ;;  %s122_s22 = smov 12  ;;  %v420_v30 = vld [vmem:[%s749_s0 + $0x55] ss:$-56 sm:%s148_s21]   ;;  %s131_s9 = smov 96 }
   0x9   :  { %v25_v25 = vsel %vm24_vm3, %v398_v22, %v20_v21  ;;  %v400_v26 = vld [vmem:[%s749_s0 + $0x167] ss:$-56 sm:%s31_s16]   ;;  %v88_v28 = vsel %vm37_vm6, %v410_v15, %v84_v24  ;;  %v421_v31 = vld [vmem:[%s749_s0 + $0x3b] sm:$0x4]   ;;  %v414_v35 = vld [vmem:[%s749_s0 + $0x5] sm:$0x1]  }
   0xa   :  { %v401_v27 = vld [vmem:[%s749_s0 + $0x30] sm:$0x80]   ;;  %v29_v29 = vsel %vm28_vm4, %v399_v23, %v25_v25  ;;  %v422_v32 = vld [vmem:[%s749_s0 + $0x5a] sm:$0x8]   ;;  %89 = vrot.lane.b32.xlu1 %v88_v28, %s469_s24  ;;  %v153_v34 = vsel %vm52_vm0, %v421_v31, %v420_v30  ;;  %v415_v36 = vld [vmem:[%s749_s0 + $0x24] sm:$0x2]  }
   0xb   :  { %v34_v33 = vsel %vm33_vm5, %v400_v26, %v29_v29  ;;  %v417_v37 = vld [vmem:[%s749_s0 + $0x29] sm:$0x10]   ;;  %v157_v39 = vsel %vm56_vm1, %v422_v32, %v153_v34  ;;  %v120_v40 = vsel %vm19_vm2, %v415_v36, %v414_v35  ;;  %v419_v42 = vld [vmem:[%s749_s0 + $0x2e] sm:$0x80]   ;;  %s198_s13 = smov 3  ;;  %s172_s16 = smov 12 }
   0xc   :  { %v38_v38 = vsel %vm37_vm6, %v401_v27, %v34_v33  ;;  %v416_v41 = vld [vmem:[%s749_s0 + $0xb5] ss:$-56 sm:%s122_s22]   ;;  %v430_v45 = vld [vmem:[%s749_s0 + $0x3a] sm:$0x4]   ;;  %v423_v49 = vld [vmem:[%s749_s0 + $0x4] sm:$0x1]  }
   0xd   :  { %39 = vrot.lane.b32.xlu0 %v38_v38, %s470_s28  ;;  %v125_v43 = vsel %vm24_vm3, %v416_v41, %v120_v40  ;;  %v418_v44 = vld [vmem:[%s749_s0 + $0x165] ss:$-56 sm:%s131_s9]   ;;  %v431_v48 = vld [vmem:[%s749_s0 + $0x59] sm:$0x8]   ;;  %s471_s23 = smov 80   ;;  %s181_s30 = smov 96 }
   0xe   :  { %v129_v46 = vsel %vm28_vm4, %v417_v37, %v125_v43  ;;  %v429_v47 = vld [vmem:[%s749_s0 + $0x54] ss:$-56 sm:%s198_s13]   ;;  %158 = vrot.lane.b32.xlu1 %v157_v39, %s471_s23  ;;  %s248_s7 = smov 3  ;;  %v439_v61 = vld [vmem:[%s749_s0 + $0x39] sm:$0x4]   ;;  %s222_s28 = smov 12 }
   0xf   :  { %v134_v50 = vsel %vm33_vm5, %v418_v44, %v129_v46  ;;  %v203_v51 = vsel %vm52_vm0, %v430_v45, %v429_v47  ;;  %v424_v52 = vld [vmem:[%s749_s0 + $0x23] sm:$0x2]   ;;  %v426_v57 = vld [vmem:[%s749_s0 + $0x28] sm:$0x10]   ;;  %v428_v59 = vld [vmem:[%s749_s0 + $0x2d] sm:$0x80]  }
  0x10   :  { %v425_v53 = vld [vmem:[%s749_s0 + $0xb4] ss:$-56 sm:%s172_s16]   ;;  %v138_v54 = vsel %vm37_vm6, %v419_v42, %v134_v50  ;;  %v207_v55 = vsel %vm56_vm1, %v431_v48, %v203_v51  ;;  %v170_v56 = vsel %vm19_vm2, %v424_v52, %v423_v49  ;;  %v440_v62 = vld [vmem:[%s749_s0 + $0x58] sm:$0x8]   ;;  %v432_v1 = vld [vmem:[%s749_s0 + $0x3] sm:$0x1]  }
  0x11   :  { %v427_v58 = vld [vmem:[%s749_s0 + $0x164] ss:$-56 sm:%s181_s30]   ;;  %139 = vrot.lane.b32.xlu0 %v138_v54, %s471_s23  ;;  %v175_v60 = vsel %vm24_vm3, %v425_v53, %v170_v56  ;;  %v433_v2 = vld [vmem:[%s749_s0 + $0x22] sm:$0x2]   ;;  %s472_s18 = smov 64   ;;  %s231_s23 = smov 96 }
  0x12   :  { %v179_v63 = vsel %vm28_vm4, %v426_v57, %v175_v60  ;;  %v438_v0 = vld [vmem:[%s749_s0 + $0x53] ss:$-56 sm:%s248_s7]   ;;  %208 = vrot.lane.b32.xlu1 %v207_v55, %s472_s18  ;;  %v220_v5 = vsel %vm19_vm2, %v433_v2, %v432_v1  ;;  %s298_s30 = smov 3  ;;  %s272_s24 = smov 12  ;;  %v448_v15 = vld [vmem:[%s749_s0 + $0x38] sm:$0x4]  }
  0x13   :  { %v184_v3 = vsel %vm33_vm5, %v427_v58, %v179_v63  ;;  %v253_v4 = vsel %vm52_vm0, %v439_v61, %v438_v0  ;;  %v434_v6 = vld [vmem:[%s749_s0 + $0xb3] ss:$-56 sm:%s222_s28]   ;;  %v447_v14 = vld [vmem:[%s749_s0 + $0x52] ss:$-56 sm:%s298_s30]   ;;  %s281_s6 = smov 96  ;;  %s473_s12 = smov 48  }
  0x14   :  { %v435_v7 = vld [vmem:[%s749_s0 + $0x27] sm:$0x10]   ;;  %v188_v8 = vsel %vm37_vm6, %v428_v59, %v184_v3  ;;  %v257_v9 = vsel %vm56_vm1, %v440_v62, %v253_v4  ;;  %v225_v10 = vsel %vm24_vm3, %v434_v6, %v220_v5  ;;  %v437_v12 = vld [vmem:[%s749_s0 + $0x2c] sm:$0x80]   ;;  %v303_v17 = vsel %vm52_vm0, %v448_v15, %v447_v14  ;;  %v449_v18 = vld [vmem:[%s749_s0 + $0x57] sm:$0x8]  }
  0x15   :  { %v436_v11 = vld [vmem:[%s749_s0 + $0x163] ss:$-56 sm:%s231_s23]   ;;  %189 = vrot.lane.b32.xlu0 %v188_v8, %s472_s18  ;;  %v229_v13 = vsel %vm28_vm4, %v435_v7, %v225_v10  ;;  %v441_v19 = vld [vmem:[%s749_s0 + $0x2] sm:$0x1]   ;;  %s348_s17 = smov 3  ;;  %s322_s18 = smov 12  ;;  %v307_v25 = vsel %vm56_vm1, %v449_v18, %v303_v17 }
  0x16   :  { %v234_v16 = vsel %vm33_vm5, %v436_v11, %v229_v13  ;;  %v442_v20 = vld [vmem:[%s749_s0 + $0x21] sm:$0x2]   ;;  %258 = vrot.lane.b32.xlu1 %v257_v9, %s473_s12  ;;  %v444_v24 = vld [vmem:[%s749_s0 + $0x26] sm:$0x10]   ;;  %v446_v28 = vld [vmem:[%s749_s0 + $0x2b] sm:$0x80]  }
  0x17   :  { %v238_v21 = vsel %vm37_vm6, %v437_v12, %v234_v16  ;;  %v270_v22 = vsel %vm19_vm2, %v442_v20, %v441_v19  ;;  %v443_v23 = vld [vmem:[%s749_s0 + $0xb2] ss:$-56 sm:%s272_s24]   ;;  %v457_v29 = vld [vmem:[%s749_s0 + $0x37] sm:$0x4]   ;;  %s331_s24 = smov 96  ;;  %s474_s8 = smov 32  }
  0x18   :  { %v275_v26 = vsel %vm24_vm3, %v443_v23, %v270_v22  ;;  %v445_v27 = vld [vmem:[%s749_s0 + $0x162] ss:$-56 sm:%s281_s6]   ;;  %v456_v31 = vld [vmem:[%s749_s0 + $0x51] ss:$-56 sm:%s348_s17]   ;;  %vm41_vm9 = vcmask 1048448   ;;  %vm91_vm10 = vcmask 917248  }
  0x19   :  { %239 = vrot.lane.b32.xlu0 %v238_v21, %s473_s12  ;;  %v279_v30 = vsel %vm28_vm4, %v444_v24, %v275_v26  ;;  %v458_v32 = vld [vmem:[%s749_s0 + $0x56] sm:$0x8]   ;;  %v353_v34 = vsel %vm52_vm0, %v457_v29, %v456_v31  ;;  %v450_v35 = vld [vmem:[%s749_s0 + $0x1] sm:$0x1]   ;;  %v453_v40 = vld [vmem:[%s749_s0 + $0x25] sm:$0x10]  }
  0x1a   :  { %v284_v33 = vsel %vm33_vm5, %v445_v27, %v279_v30  ;;  %v451_v36 = vld [vmem:[%s749_s0 + $0x20] sm:$0x2]   ;;  %308 = vrot.lane.b32.xlu1 %v307_v25, %s474_s8  ;;  %v357_v42 = vsel %vm56_vm1, %v458_v32, %v353_v34  ;;  %v455_v44 = vld [vmem:[%s749_s0 + $0x2a] sm:$0x80]   ;;  %vm141_vm11 = vcmask 786048   ;;  %vm191_vm12 = vcmask 654848  }
  0x1b   :  { %v452_v37 = vld [vmem:[%s749_s0 + $0xb1] ss:$-56 sm:%s322_s18]   ;;  %v288_v38 = vsel %vm37_vm6, %v446_v28, %v284_v33  ;;  %v320_v39 = vsel %vm19_vm2, %v451_v36, %v450_v35  ;;  %v2_v45 = vld [vmem:[%s749_s0] ss:$8 sm:$0xf]   ;;  %vm241_vm13 = vcmask 523648  }
  0x1c   :  { %v454_v41 = vld [vmem:[%s749_s0 + $0x161] ss:$-56 sm:%s331_s24]   ;;  %v325_v43 = vsel %vm24_vm3, %v452_v37, %v320_v39  ;;  %v3_v47 = vld [vmem:[%s749_s0] ss:$8 sm:$0xf0]   ;;  %vm291_vm14 = vcmask 392448  }
  0x1d   :  { %289 = vrot.lane.b32.xlu0 %v288_v38, %s474_s8  ;;  %v329_v46 = vsel %vm28_vm4, %v453_v40, %v325_v43  ;;  %v5_v49 = vsel %vm4_vm7, %v3_v47, %v2_v45  ;;  %v395_v50 = vld [vmem:[%s749_s0 + $0x40] ss:$8 sm:$0xf]   ;;  %s475_s0 = smov 16   ;;  %vm341_vm15 = vcmask 261248  }
  0x1e   :  { %v334_v48 = vsel %vm33_vm5, %v454_v41, %v329_v46  ;;  %358 = vrot.lane.b32.xlu1 %v357_v42, %s475_s0  ;;  %7 = vst.msk [vmem:[#allocation0] ss:$8 sm:$0xf] %vm6_vm8, %v5_v49   ;;  %9 = vst.msk [vmem:[#allocation0 - $0x1f] ss:$8 sm:$0xf0] %vm6_vm8, %v5_v49  }
  0x1f   :  { %v338_v51 = vsel %vm37_vm6, %v455_v44, %v334_v48  ;;  %14 = vst.msk [vmem:[#allocation0 + $0x2] ss:$8 sm:$0xf] %vm6_vm8, %v395_v50  }
  0x21   :  { %339 = vrot.lane.b32.xlu0 %v338_v51, %s475_s0 }
  0x77   :  { %v109_v52 = vpop.permute.xlu1 %108   ;;  %v59_v53 = vpop.permute.xlu0 %58  }
  0x78   :  { %62 = vst.msk [vmem:[#allocation0 + $0x12] ss:$6 sm:$0x3] %vm41_vm9, %v59_v53   ;;  %64 = vst.msk [vmem:[#allocation0 + $0x17] sm:$0xc] %vm41_vm9, %v59_v53  }
  0x79   :  { %112 = vst.msk [vmem:[#allocation0 + $0x12] ss:$6 sm:$0x3] %vm91_vm10, %v109_v52   ;;  %114 = vst.msk [vmem:[#allocation0 + $0x17] sm:$0xc] %vm91_vm10, %v109_v52  }
  0x7c   :  { %v90_v54 = vpop.permute.xlu1 %89  }
  0x7f   :  { %v40_v55 = vpop.permute.xlu0 %39  }
  0x80   :  { %42 = vst.msk [vmem:[#allocation0] sm:$0x7] %vm41_vm9, %v40_v55   ;;  %44 = vst.msk [vmem:[#allocation0 + $0x5] sm:$0x38] %vm41_vm9, %v40_v55   ;;  %v159_v56 = vpop.permute.xlu1 %158  }
  0x81   :  { %46 = vst.msk [vmem:[#allocation0 + $0xa] sm:$0xc0] %vm41_vm9, %v40_v55  }
  0x82   :  { %92 = vst.msk [vmem:[#allocation0] sm:$0x7] %vm91_vm10, %v90_v54   ;;  %94 = vst.msk [vmem:[#allocation0 + $0x5] sm:$0x38] %vm91_vm10, %v90_v54  }
  0x83   :  { %96 = vst.msk [vmem:[#allocation0 + $0xa] sm:$0xc0] %vm91_vm10, %v90_v54   ;;  %v140_v57 = vpop.permute.xlu0 %139  }
  0x84   :  { %162 = vst.msk [vmem:[#allocation0 + $0x12] ss:$6 sm:$0x3] %vm141_vm11, %v159_v56   ;;  %164 = vst.msk [vmem:[#allocation0 + $0x17] sm:$0xc] %vm141_vm11, %v159_v56   ;;  %v209_v58 = vpop.permute.xlu1 %208  }
  0x85   :  { %142 = vst.msk [vmem:[#allocation0] sm:$0x7] %vm141_vm11, %v140_v57   ;;  %144 = vst.msk [vmem:[#allocation0 + $0x5] sm:$0x38] %vm141_vm11, %v140_v57  }
  0x86   :  { %146 = vst.msk [vmem:[#allocation0 + $0xa] sm:$0xc0] %vm141_vm11, %v140_v57  }
  0x87   :  { %212 = vst.msk [vmem:[#allocation0 + $0x12] ss:$6 sm:$0x3] %vm191_vm12, %v209_v58   ;;  %214 = vst.msk [vmem:[#allocation0 + $0x17] sm:$0xc] %vm191_vm12, %v209_v58   ;;  %v190_v59 = vpop.permute.xlu0 %189  }
  0x88   :  { %192 = vst.msk [vmem:[#allocation0] sm:$0x7] %vm191_vm12, %v190_v59   ;;  %194 = vst.msk [vmem:[#allocation0 + $0x5] sm:$0x38] %vm191_vm12, %v190_v59   ;;  %v259_v60 = vpop.permute.xlu1 %258  }
  0x89   :  { %196 = vst.msk [vmem:[#allocation0 + $0xa] sm:$0xc0] %vm191_vm12, %v190_v59  }
  0x8a   :  { %262 = vst.msk [vmem:[#allocation0 + $0x12] ss:$6 sm:$0x3] %vm241_vm13, %v259_v60   ;;  %264 = vst.msk [vmem:[#allocation0 + $0x17] sm:$0xc] %vm241_vm13, %v259_v60  }
  0x8b   :  { %v240_v61 = vpop.permute.xlu0 %239  }
  0x8c   :  { %242 = vst.msk [vmem:[#allocation0] sm:$0x7] %vm241_vm13, %v240_v61   ;;  %244 = vst.msk [vmem:[#allocation0 + $0x5] sm:$0x38] %vm241_vm13, %v240_v61   ;;  %v309_v62 = vpop.permute.xlu1 %308  }
  0x8d   :  { %246 = vst.msk [vmem:[#allocation0 + $0xa] sm:$0xc0] %vm241_vm13, %v240_v61  }
  0x8e   :  { %312 = vst.msk [vmem:[#allocation0 + $0x12] ss:$6 sm:$0x3] %vm291_vm14, %v309_v62   ;;  %314 = vst.msk [vmem:[#allocation0 + $0x17] sm:$0xc] %vm291_vm14, %v309_v62  }
  0x8f   :  { %v290_v63 = vpop.permute.xlu0 %289  }
  0x90   :  { %292 = vst.msk [vmem:[#allocation0] sm:$0x7] %vm291_vm14, %v290_v63   ;;  %294 = vst.msk [vmem:[#allocation0 + $0x5] sm:$0x38] %vm291_vm14, %v290_v63   ;;  %v359_v0 = vpop.permute.xlu1 %358  }
  0x91   :  { %296 = vst.msk [vmem:[#allocation0 + $0xa] sm:$0xc0] %vm291_vm14, %v290_v63  }
  0x92   :  { %362 = vst.msk [vmem:[#allocation0 + $0x12] ss:$6 sm:$0x3] %vm341_vm15, %v359_v0   ;;  %364 = vst.msk [vmem:[#allocation0 + $0x17] sm:$0xc] %vm341_vm15, %v359_v0  }
  0x93   :  { %v340_v1 = vpop.permute.xlu0 %339  }
  0x94   :  { %342 = vst.msk [vmem:[#allocation0] sm:$0x7] %vm341_vm15, %v340_v1   ;;  %344 = vst.msk [vmem:[#allocation0 + $0x5] sm:$0x38] %vm341_vm15, %v340_v1  }
  0x95   :  { %346 = vst.msk [vmem:[#allocation0 + $0xa] sm:$0xc0] %vm341_vm15, %v340_v1  }
  0x99   :  { %v387_v2 = vld [vmem:[#allocation0 + $0x18] sm:$0xf] }
  0x9a   :  { %461 = vst [vmem:[%s750_s1 + $0xc] sm:$0xf] %v387_v2 }
  0x9b   :  { %v369_v3 = vld [vmem:[#allocation0] sm:$0xf]  ;;  %v374_v4 = vld [vmem:[#allocation0 + $0x8] sm:$0xf] }
  0x9c   :  { %v380_v5 = vld [vmem:[#allocation0 + $0x10] sm:$0xf]  ;;  %372 = vst [vmem:[%s750_s1] sm:$0xf] %v369_v3  ;;  %459 = vst [vmem:[%s750_s1 + $0x4] sm:$0xf] %v374_v4 }
  0x9d   :  { %460 = vst [vmem:[%s750_s1 + $0x8] sm:$0xf] %v380_v5 }

// kernel: flat_shader.1
= control target key start
LH: loop header
LB: loop body
LE: loop exit
PB: predicated region body
PF: predicated region fallthrough
CT: control target
= control target key end

     0   :  { %s1013_s15 = smov 0   ;;  %s1131_s0 = inlined_call_operand.vmem [shape: f32[4,1], index: 0, kind: input, shape index: {}]   ;;  %s1132_s1 = inlined_call_operand.vmem [shape: f32[9,20], index: 1, kind: input, shape index: {}]   ;;  %s1133_s2 = inlined_call_operand.vmem [shape: f32[3,512], index: 2, kind: input, shape index: {}]   ;;  %s1134_s3 = inlined_call_operand.vmem [shape: s32[1,512], index: 3, kind: input, shape index: {}]   ;;  %s1135_s4 = inlined_call_operand.vmem [shape: f32[4,512], index: 4, kind: output, shape index: {}]  }
   0x1 LB: > { %s860_s16 = sadd.s32 4294967295, %s983_s15   ;;  %p864_p0 = scmp.ge.s32.totalorder %s983_s15, 1  ;;  %s983_s15 = sphi %s1013_s15, %s14_s15  }
   0x2   : > { %p169_p1 = scmp.lt.s32.totalorder %s983_s15, 5 }
   0x4   : > { %p170_p2 = pnand %p864_p0, %p169_p1 }
   0x5   : > { %p196_p3 = scmp.lt.s32.totalorder (!%p170_p2), %s860_s16, 3 }
   0x6   : > { %173 = sbr.rel (%p170_p2) target bundleno = 255 (0xff), region = 36 }
   0xb   : > { %v210_v0 = vlaneseq  ;;  %v227_v1 = vld [vmem:[%s1132_s1] sm:$0xff]  ;;  %v228_v2 = vld [vmem:[%s1132_s1 + $0x8] sm:$0x1]  ;;  %vm229_vm0 = vcmask 162816   ;;  %s1141_s16 = smov (!%p196_p3, %s860_s16), 3  ;;  %v985_v7 = vmov 0  }
   0xc   : > { %v783_v3 = vld [vmem:[%s1131_s0] sm:$0x7]  ;;  %v231_v5 = vsel %vm229_vm0, %v227_v1, 0  ;;  %v234_v6 = vsel %vm229_vm0, %v228_v2, 0  ;;  %976 = vset.pattern.permute.xlu0 %v985_v7  ;;  %s202_s25 = scalar_lea.vmem %s1134_s3, %s1141_s16  ;;  %vm236_vm2 = vcmask 1043456   ;;  %v986_v22 = vmov 0.0  }
   0xd   : > { %v1032_v4 = vshrl.u32 %v210_v0, 7  ;;  %v1034_v8 = vand.u32 4294901760, %v231_v5  ;;  %v1036_v9 = vand.u32 4294901760, %v234_v6  ;;  %786 = vperm.xlu0 %976, %v783_v3   ;;  %v207_v13 = vld [vmem:[%s202_s25] sm:$0x1]  ;;  %v987_v33 = vmov 1.0  }
   0xe   : > { %vm208_vm1 = vcmp.lt.s32.totalorder %v207_v13, 0  ;;  %s865_s26 = sshll.u32 %s1141_s16, 2  ;;  %vm777_vm6 = vcmask 1041408  }
   0xf   : > { %v213_v10 = vadd.s32 16, %v1032_v4  ;;  %v1044_v11 = vsub.s32 0, %v1032_v4  ;;  %v212_v12 = vadd.s32 8, %v1032_v4  ;;  %v1048_v14 = vsub.f32 %v231_v5, %v1034_v8  ;;  %926 = vmatprep.mubr.f32.mxu1 %v1034_v8  ;;  %s1116_s29 = scalar_lea.vmem %s1135_s4, %s865_s26  ;;  %s199_s6 = scalar_lea.vmem %s1133_s2, %s865_s26 }
  0x10   : > { %v1051_v15 = vsub.f32 %v234_v6, %v1036_v9  ;;  %v1057_v19 = vsel %vm208_vm1, 1, %v985_v7  ;;  %797 = vst [vmem:[%s1116_s29 + $0x3] sm:$0x1] %v987_v33  ;;  %v771_v56 = vsub.s32 2, %v1032_v4  ;;  %v209_v59 = vld [vmem:[%s199_s6] sm:$0x7] }
  0x11   : > { %v217_v16 = vrot.slane %v207_v13, %v1044_v11  ;;  %v310_v17 = vand.u32 4294901760, %v1048_v14  ;;  %v762_v61 = vsub.s32 1, %v1032_v4  ;;  %v793_v13 = vrot.slane %v1057_v19, %v1044_v11 }
  0x12   : > { %v320_v18 = vand.u32 4294901760, %v1051_v15  ;;  %v772_v0 = vrot.slane %v209_v59, %v771_v56 }
  0x13   : > { %vm220_vm3 = vcmp.eq.s32.totalorder %v213_v10, %v217_v16  ;;  %vm1059_vm4 = vcmp.eq.s32.totalorder %v212_v12, %v217_v16  ;;  %vm1064_vm5 = vcmp.eq.s32.totalorder %v1032_v4, %v217_v16  ;;  %v311_v24 = vsub.f32 %v1048_v14, %v310_v17 }
  0x14   : > { %v869_v23 = vsel %vm220_vm3, 1.0, %v986_v22  ;;  %v868_v25 = vsel %vm1059_vm4, 1.0, %v986_v22  ;;  %v321_v26 = vsub.f32 %v1051_v15, %v320_v18  ;;  %v867_v29 = vsel %vm1064_vm5, 1.0, %v986_v22 }
  0x15   : > { %911 = vmatprep.subr.msk.mxu0 %vm236_vm2, %v869_v23  ;;  %v238_v27 = vsel %vm236_vm2, %v869_v23, 0  ;;  %v363_v28 = vsub.f32 %v868_v25, %v868_v25  ;;  %v312_v31 = vand.u32 4294901760, %v311_v24  ;;  %v370_v32 = vsub.f32 %v867_v29, %v867_v29 }
  0x16   : > { %912 = vmatpush3.msk.msra.mxu0 %vm236_vm2, %v869_v23  ;;  %v356_v30 = vsub.f32 %v238_v27, %v238_v27  ;;  %v322_v35 = vand.u32 4294901760, %v321_v26  ;;  %v763_v5 = vrot.slane %v209_v59, %v762_v61  ;;  %vm794_vm7 = vcmp.eq.s32.totalorder %v793_v13, 1 }
  0x17   : > { %913 = vmatprep.subr.msk.mxu0 %vm1059_vm4, %v987_v33  ;;  %v364_v34 = vand.u32 4294901760, %v363_v28  ;;  %917 = vmatprep.mubr.f32.mxu0 %v312_v31  ;;  %v371_v37 = vand.u32 4294901760, %v370_v32 }
  0x18   : > { %914 = vmatpush3.msk.msra.mxu0 %vm1059_vm4, %v987_v33  ;;  %v357_v36 = vand.u32 4294901760, %v356_v30 }
  0x19   : > { %915 = vmatprep.subr.msk.mxu0 %vm1064_vm5, %v987_v33  ;;  %v365_v38 = vsub.f32 %v363_v28, %v364_v34  ;;  %v372_v40 = vsub.f32 %v370_v32, %v371_v37 }
  0x1a   : > { %v358_v39 = vsub.f32 %v356_v30, %v357_v36  ;;  %916 = vmatpush3.msk.msra.mxu0 %vm1064_vm5, %v987_v33 }
  0x1b   : > { %929 = vmatprep.subr.mxu0 %v356_v30  ;;  %918 = vmatmul.mubr.f32.vlgmr.msra.gmra.mxu0 %v322_v35  ;;  %v366_v42 = vand.u32 4294901760, %v365_v38  ;;  %v373_v43 = vand.u32 4294901760, %v372_v40 }
  0x1c   : > { %v359_v41 = vand.u32 4294901760, %v358_v39  ;;  %930 = vmatpush3.msra.mxu0 %v356_v30  ;;  %935 = vmatprep.mubr.f32.mxu0 %v1048_v14 }
  0x1d   : > { %931 = vmatprep.subr.mxu0 %v363_v28 }
  0x1e   : > { %920 = vmatprep.subr.mxu1 %v359_v41  ;;  %932 = vmatpush3.msra.mxu0 %v363_v28 }
  0x1f   : > { %921 = vmatpush3.msra.mxu1 %v359_v41  ;;  %933 = vmatprep.subr.mxu0 %v370_v32 }
  0x20   : > { %922 = vmatprep.subr.mxu1 %v366_v42  ;;  %934 = vmatpush3.msra.mxu0 %v370_v32 }
  0x21   : > { %923 = vmatpush3.msra.mxu1 %v366_v42  ;;  %936 = vmatmul.mubr.f32.vlgmr.msra.gmra.mxu0 %v1051_v15 }
  0x22   : > { %924 = vmatprep.subr.mxu1 %v373_v43  ;;  %947 = vmatprep.subr.mxu0 %v357_v36 }
  0x23   : > { %925 = vmatpush3.msra.mxu1 %v373_v43  ;;  %948 = vmatpush3.msra.mxu0 %v357_v36 }
  0x24   : > { %927 = vmatmul.mubr.f32.vlgmr.msra.gmra.mxu1 %v1036_v9  ;;  %938 = vmatprep.subr.msk.mxu1 %vm236_vm2, %v869_v23 }
  0x25   : > { %939 = vmatpush3.msk.msra.mxu1 %vm236_vm2, %v869_v23  ;;  %949 = vmatprep.subr.mxu0 %v364_v34 }
  0x26   : > { %940 = vmatprep.subr.msk.mxu1 %vm1059_vm4, %v987_v33  ;;  %944 = vmatprep.mubr.f32.mxu1 %v310_v17 }
  0x27   : > { %941 = vmatpush3.msk.msra.mxu1 %vm1059_vm4, %v987_v33  ;;  %950 = vmatpush3.msra.mxu0 %v364_v34 }
  0x28   : > { %942 = vmatprep.subr.msk.mxu1 %vm1064_vm5, %v987_v33  ;;  %951 = vmatprep.subr.mxu0 %v371_v37 }
  0x29   : > { %943 = vmatpush3.msk.msra.mxu1 %vm1064_vm5, %v987_v33  ;;  %952 = vmatpush3.msra.mxu0 %v371_v37 }
  0x2a   : > { %945 = vmatmul.mubr.f32.vlgmr.msra.gmra.mxu1 %v320_v18  ;;  %956 = vmatprep.subr.msk.mxu1 %vm236_vm2, %v869_v23 }
  0x2b   : > { %953 = vmatprep.mubr.f32.mxu0 %v1034_v8  ;;  %957 = vmatpush3.msk.msra.mxu1 %vm236_vm2, %v869_v23 }
  0x2c   : > { %954 = vmatmul.mubr.f32.vlgmr.msra.gmra.mxu0 %v1036_v9  ;;  %958 = vmatprep.subr.msk.mxu1 %vm1059_vm4, %v987_v33 }
  0x2d   : > { %959 = vmatpush3.msk.msra.mxu1 %vm1059_vm4, %v987_v33  ;;  %962 = vmatprep.mubr.f32.mxu1 %v1034_v8 }
  0x2e   : > { %960 = vmatprep.subr.msk.mxu1 %vm1064_vm5, %v987_v33 }
  0x2f   : > { %961 = vmatpush3.msk.msra.mxu1 %vm1064_vm5, %v987_v33 }
  0x30   : > { %963 = vmatmul.mubr.f32.vlgmr.msra.gmra.mxu1 %v1036_v9  ;;  %v758_v9 = vrot.slane %v209_v59, %v1044_v11 }
  0x88   : > { %v787_v20 = vpop.permute.xlu0 %786 }
  0xdb   : > { %v919_v44 = vpop.f32.mrf.mxu0 }
  0xdd   : > { %v314_v45 = vpop.f32.mrf.mxu0 }
  0xe1   : > { %v937_v47 = vpop.f32.mrf.mxu0 }
  0xe3   : > { %v494_v51 = vpop.f32.mrf.mxu0 }
  0xe4   : > { %v928_v46 = vpop.f32.mrf.mxu1 }
  0xe5   : > { %v417_v48 = vadd.f32 %v928_v46, %v919_v44 }
  0xe6   : > { %v410_v49 = vpop.f32.mrf.mxu1 }
  0xe7   : > { %v411_v50 = vadd.f32 %v410_v49, %v314_v45  ;;  %v502_v52 = vadd.f32 %v937_v47, %v417_v48 }
  0xe9   : > { %v495_v54 = vadd.f32 %v494_v51, %v411_v50 }
  0xea   : > { %v946_v53 = vpop.f32.mrf.mxu1 }
  0xeb   : > { %v586_v55 = vadd.f32 %v946_v53, %v502_v52 }
  0xec   : > { %v577_v57 = vpop.f32.mrf.mxu1  ;;  %v955_v58 = vpop.f32.mrf.mxu0 }
  0xed   : > { %v578_v60 = vadd.f32 %v577_v57, %v495_v54  ;;  %v672_v63 = vadd.f32 %v955_v58, %v586_v55 }
  0xee   : > { %v665_v62 = vpop.f32.mrf.mxu0 }
  0xef   : > { %v666_v2 = vadd.f32 %v665_v62, %v578_v60 }
  0xf0   : > { %v964_v1 = vpop.f32.mrf.mxu1 }
  0xf1   : > { %v752_v3 = vadd.f32 %v964_v1, %v672_v63 }
  0xf2   : > { %v745_v6 = vpop.f32.mrf.mxu1 }
  0xf3   : > { %v774_v7 = vmul.f32 %v772_v0, %v752_v3  ;;  %v746_v8 = vadd.f32 %v745_v6, %v666_v2 }
  0xf5   : > { %v764_v10 = vmul.f32 %v763_v5, %v746_v8  ;;  %v773_v12 = vmul.f32 %v772_v0, %v746_v8  ;;  %v779_v4 = vrot.slane %v774_v7, 6  ;;  %v759_v14 = vmul.f32 %v758_v9, %v746_v8 }
  0xf7   : > { %v766_v15 = vrot.slane %v764_v10, 3  ;;  %v778_v16 = vrot.slane %v773_v12, 6 }
  0xf9   : > { %v768_v17 = vadd.f32 %v766_v15, %v759_v14  ;;  %v780_v18 = vsel %vm777_vm6, %v778_v16, %v779_v4 }
  0xfb   : > { %v782_v21 = vadd.f32 %v780_v18, %v768_v17 }
  0xfd   : > { %v795_v22 = vsel %vm794_vm7, %v787_v20, %v782_v21 }
  0xfe   : > { %796 = vst [vmem:[%s1116_s29] sm:$0x7] %v795_v22 }
  0xff PF: > { %s14_s15 = sadd.s32 1, %s983_s15  }
 0x100   : > { %p11_p4 = scmp.ge.s32.totalorder %s14_s15, 6  }
 0x102   :  { %13 = sbr.rel (!%p11_p4) target bundleno = 1 (0x1), region = 69 }

</bundles_post_ra>
